<compile_context>
chip_gen: v6e
topology: v6e:2x2x1
jax: 0.10.0
libtpu: 0.0.40
codegen_flags: <defaults>
</compile_context>

<pallas_src>
import functools

import jax
import jax.numpy as jnp
from jax.experimental import pallas as pl
from jax.experimental.pallas import tpu as pltpu


def _ceil_div(a, b):
    return -(-a // b)


def _round_up(a, b):
    return _ceil_div(a, b) * b


def _threshold_kernel(x_ref, thresh_ref, o_ref, *, thresh_k, compute_dtype):
    # thresh_ref: (1, TL) float32 -- never downcast before squaring.
    th = thresh_ref[...]
    thr_sq = (th * th).astype(compute_dtype)
    x = x_ref[...].astype(compute_dtype)              # (TB, TL)
    z = x - thr_sq                                    # broadcast over rows
    # sigmoid(2*k*z) == 0.5 * (tanh(k*z) + 1): one EUP transcendental per elem.
    y = 0.5 * (jnp.tanh(thresh_k * z) + 1.0)
    o_ref[...] = y.astype(o_ref.dtype)


def _pick_compute_dtype(x_dtype):
    """bf16 math only where the VPU/EUP support it (v6e / v7x); f32 otherwise."""
    if x_dtype == jnp.bfloat16:
        try:
            kind = jax.devices()[0].device_kind.lower()
        except Exception:
            kind = ""
        if ("v6" in kind) or ("v7" in kind):
            return jnp.bfloat16
    return jnp.float32


def _choose_tiles(n_rows, lane_len, itemsize, target_bytes):
    """Pick (row_tile, lane_tile): ~target_bytes, layout-legal, >=2 grid steps."""
    sub = max(8, 32 // itemsize)   # sublane packing: 8 f32 / 16 bf16 / 32 int8
    # Lane tile: full extent when it fits the budget at minimal row depth,
    # otherwise a multiple of 128 (bounds VMEM for very large R*D).
    if lane_len > 128 and sub * lane_len * itemsize > target_bytes:
        tl = max(128, (target_bytes // (sub * itemsize * 128)) * 128)
        tl = min(tl, (lane_len // 128) * 128)
    else:
        tl = lane_len
    # Row tile: ~target_bytes, sublane-aligned (or full extent if tiny).
    if n_rows <= sub:
        tb = n_rows
    else:
        tb = max(sub, (target_bytes // max(1, tl * itemsize)) // sub * sub)
        tb = min(tb, _round_up(n_rows, sub))
    # v7x has two TensorCores: make sure the "parallel" grid has >= 2 steps.
    if _ceil_div(n_rows, tb) * _ceil_div(lane_len, tl) < 2:
        if n_rows > sub:
            tb = min(tb, max(sub, _round_up(_ceil_div(n_rows, 2), sub)))
        elif tl == lane_len and lane_len >= 256 and lane_len % 128 == 0:
            tl = _round_up(_ceil_div(lane_len, 2), 128)
    return tb, tl


def _io_spec(block_shape, index_map, buffer_count=None):
    """BlockSpec with deeper multi-buffering when this jax supports it."""
    if buffer_count is not None and hasattr(pl, "Buffered"):
        try:
            return pl.BlockSpec(block_shape, index_map,
                                pipeline_mode=pl.Buffered(buffer_count))
        except TypeError:  # older jax: no pipeline_mode kwarg
            pass
    return pl.BlockSpec(block_shape, index_map)


def _pallas_threshold_2d(x2, th2, thresh_k, compute_dtype, target_tile_bytes,
                         pipeline_depth):
    n_rows, lane = x2.shape
    itemsize = jnp.dtype(x2.dtype).itemsize
    tb, tl = _choose_tiles(n_rows, lane, itemsize, target_tile_bytes)
    grid = (_ceil_div(n_rows, tb), _ceil_div(lane, tl))

    kernel = functools.partial(_threshold_kernel, thresh_k=float(thresh_k),
                               compute_dtype=compute_dtype)
    return pl.pallas_call(
        kernel,
        out_shape=jax.ShapeDtypeStruct((n_rows, lane), x2.dtype),
        grid_spec=pltpu.PrefetchScalarGridSpec(
            num_scalar_prefetch=0,
            grid=grid,
            in_specs=[
                _io_spec((tb, tl), lambda i, j: (i, j), pipeline_depth),
                # thresh: constant over the row axis -> fetched once per lane
                # tile and VMEM-resident (it is a single tiny f32 row).
                pl.BlockSpec((1, tl), lambda i, j: (0, j)),
            ],
            out_specs=_io_spec((tb, tl), lambda i, j: (i, j), pipeline_depth),
        ),
        compiler_params=pltpu.CompilerParams(
            dimension_semantics=("parallel", "parallel"),
            # ~25 MiB worst case with 3-deep buffers of ~4 MiB tiles; leaves
            # headroom under v7x's 64 MiB physical VMEM (128 MiB on v5e/v6e).
            vmem_limit_bytes=48 * 1024 * 1024,
        ),
    )(x2, th2)


def threshold_forward(x, thresh, thresh_k=1.0, *, min_pallas_elems=16384,
                      target_tile_bytes=4 * 1024 * 1024):
    """x: (B, R, D), thresh: (R, D) -> sigmoid(2*k*(x - thresh**2)) in x.dtype."""
    B, R, D = x.shape
    assert thresh.shape == (R, D)
    L = R * D
    total = B * L
    th_f32 = thresh.astype(jnp.float32)   # square in f32 (matches f32 Parameter)

    # Tiny-input fast path: pallas_call + (8,128) padding overhead dominates.
    if total <= min_pallas_elems:
        z = x.astype(jnp.float32) - (th_f32 * th_f32)[None]
        return jax.nn.sigmoid(2.0 * float(thresh_k) * z).astype(x.dtype)

    # Wrapper-side layout plumbing only (no compute hoisted out of the kernel):
    # present the most lane-dense 2-D view we can so stores are unmasked vst.
    if L % 128 == 0:
        x2 = x.reshape(B, L)
        th2 = th_f32.reshape(1, L)
    elif 128 % L == 0 and total % 128 == 0:
        # e.g. L = 64: pack 128 // L full (R, D) periods per 128-lane row and
        # tile the thresh row to match, so the lane dim is a clean 128.
        reps = 128 // L
        x2 = x.reshape(total // 128, 128)
        th2 = jnp.tile(th_f32.reshape(1, L), (1, reps))
    else:
        # TODO(synk): generic non-128-aligned L keeps masked (vst.msk) stores;
        # a padded-L layout would trade extra HBM traffic for dense stores.
        x2 = x.reshape(B, L)
        th2 = th_f32.reshape(1, L)

    compute_dtype = _pick_compute_dtype(x.dtype)
    try:
        out2 = _pallas_threshold_2d(x2, th2, thresh_k, compute_dtype,
                                    target_tile_bytes, pipeline_depth=3)
    except Exception:
        # Older jax without pipeline_mode support at lowering time: retry with
        # the default double-buffered pipeline.
        out2 = _pallas_threshold_2d(x2, th2, thresh_k, compute_dtype,
                                    target_tile_bytes, pipeline_depth=None)
    return out2.reshape(B, R, D)


if __name__ == "__main__":
    key = jax.random.PRNGKey(0)
    k1, k2, k3, k4 = jax.random.split(key, 4)

    def reference(x, thresh, k=1.0):
        z = x.astype(jnp.float32) - thresh.astype(jnp.float32) ** 2
        return jax.nn.sigmoid(2.0 * k * z)

    # 1) Module-default tiny shape (batch=2, num_rules=4, num_detectors=16):
    #    plain-XLA fast path (pallas_call overhead would dominate here).
    x_a = jax.random.normal(k1, (2, 4, 16), jnp.float32)
    th_a = jax.random.normal(k2, (4, 16), jnp.float32)
    out_a = jax.block_until_ready(threshold_forward(x_a, th_a, thresh_k=1.0))
    assert out_a.shape == (2, 4, 16)
    assert jnp.allclose(out_a, reference(x_a, th_a), atol=1e-5)

    # 2) Pallas path, L = R*D multiple of 128 (lane-dense (B, L) layout).
    x_b = jax.random.normal(k3, (16, 8, 32), jnp.float32)    # L = 256
    th_b = jax.random.normal(k4, (8, 32), jnp.float32)
    out_b = jax.block_until_ready(
        threshold_forward(x_b, th_b, thresh_k=1.0, min_pallas_elems=0))
    assert out_b.shape == (16, 8, 32)
    assert jnp.allclose(out_b, reference(x_b, th_b), atol=1e-5)

    # 3) Pallas path, L = 64: the 128 % L == 0 re-flatten-to-(.., 128) layout.
    x_c = jax.random.normal(k1, (16, 4, 16), jnp.float32)    # L = 64
    th_c = jax.random.normal(k2, (4, 16), jnp.float32)
    out_c = jax.block_until_ready(
        threshold_forward(x_c, th_c, thresh_k=1.0, min_pallas_elems=0))
    assert jnp.allclose(out_c, reference(x_c, th_c), atol=1e-5)

    # 4) Pallas path, bf16 activations (bf16 math on v6e/v7x, f32 elsewhere);
    #    thresh stays f32 so the squared parameter is not downcast.
    x_d = jax.random.normal(k3, (16, 8, 32), jnp.float32).astype(jnp.bfloat16)
    th_d = jax.random.normal(k4, (8, 32), jnp.float32)
    out_d = jax.block_until_ready(
        threshold_forward(x_d, th_d, thresh_k=1.0, min_pallas_elems=0))
    assert out_d.dtype == jnp.bfloat16
    assert jnp.allclose(out_d.astype(jnp.float32), reference(x_d, th_d),
                        atol=3e-2)

    # TODO(synk): the torch.isnan + raise branch is data-dependent control
    # flow; kept as a host-side check rather than inside the kernel.
    assert not bool(jnp.isnan(out_b).any()), "Nan in threshold aggregation!"

    print("KERNEL_OK")
</pallas_src>

<mosaic_0001>
module attributes {stable_mosaic.version = 11 : i64} {
  func.func @_threshold_kernel(%arg0: i32, %arg1: i32, %arg2: memref<8x256xf32, #tpu.memory_space<vmem>>, %arg3: memref<1x256xf32, #tpu.memory_space<vmem>>, %arg4: memref<8x256xf32, #tpu.memory_space<vmem>>) attributes {dimension_semantics = [#tpu.dimension_semantics<parallel>, #tpu.dimension_semantics<parallel>], iteration_bounds = array<i64: 2, 1>, scalar_prefetch = 0 : i64, scratch_operands = 0 : i64, tpu.core_type = #tpu.core_type<tc>, window_params = [{transform_indices = @transform_0, window_bounds = array<i64: 8, 256>}, {transform_indices = @transform_1, window_bounds = array<i64: 1, 256>}, {transform_indices = @transform_2, window_bounds = array<i64: 8, 256>}]} {
    %c0 = arith.constant 0 : index
    %c0_0 = arith.constant 0 : index
    %0 = vector.load %arg3[%c0, %c0_0] : memref<1x256xf32, #tpu.memory_space<vmem>>, vector<1x256xf32>
    %1 = arith.mulf %0, %0 : vector<1x256xf32>
    %c0_1 = arith.constant 0 : index
    %c0_2 = arith.constant 0 : index
    %2 = vector.load %arg2[%c0_1, %c0_2] : memref<8x256xf32, #tpu.memory_space<vmem>>, vector<8x256xf32>
    %3 = vector.broadcast %1 : vector<1x256xf32> to vector<8x256xf32>
    %4 = arith.subf %2, %3 : vector<8x256xf32>
    %cst = arith.constant 1.000000e+00 : f32
    %5 = vector.broadcast %cst : f32 to vector<8x256xf32>
    %6 = arith.mulf %5, %4 : vector<8x256xf32>
    %7 = math.tanh %6 : vector<8x256xf32>
    %cst_3 = arith.constant 1.000000e+00 : f32
    %8 = vector.broadcast %cst_3 : f32 to vector<8x256xf32>
    %9 = arith.addf %7, %8 : vector<8x256xf32>
    %cst_4 = arith.constant 5.000000e-01 : f32
    %10 = vector.broadcast %cst_4 : f32 to vector<8x256xf32>
    %11 = arith.mulf %10, %9 : vector<8x256xf32>
    %c0_5 = arith.constant 0 : index
    %c0_6 = arith.constant 0 : index
    %12 = vector.load %arg4[%c0_5, %c0_6] : memref<8x256xf32, #tpu.memory_space<vmem>>, vector<8x256xf32>
    tpu.vector_store %arg4[%c0_5, %c0_6], %11 {strides = array<i32>} : memref<8x256xf32, #tpu.memory_space<vmem>>, vector<8x256xf32>,
    return
  }
  func.func @transform_0(%arg0: i32, %arg1: i32) -> (i32, i32) {
    %c0_i32 = arith.constant 0 : i32
    return %arg0, %arg1 : i32, i32
  }
  func.func @transform_1(%arg0: i32, %arg1: i32) -> (i32, i32) {
    %c0_i32 = arith.constant 0 : i32
    %c0_i32_0 = arith.constant 0 : i32
    return %c0_i32, %arg1 : i32, i32
  }
  func.func @transform_2(%arg0: i32, %arg1: i32) -> (i32, i32) {
    %c0_i32 = arith.constant 0 : i32
    return %arg0, %arg1 : i32, i32
  }
}

</mosaic_0001>

<bundles_post_ra>
// kernel: tpu_custom_call.1
= control target key start
LH: loop header
LB: loop body
LE: loop exit
PB: predicated region body
PF: predicated region fallthrough
CT: control target
= control target key end

     0   :  { %7 = vsyncpa [#allocation3], 0  ;;  %s761_s0 = inlined_call_operand.hbm [shape: f32[16,256], index: 0, kind: input, shape index: {}]   ;;  %s762_s1 = inlined_call_operand.hbm [shape: f32[1,256], index: 1, kind: input, shape index: {}]   ;;  %s763_s2 = inlined_call_operand.hbm [shape: f32[16,256], index: 2, kind: output, shape index: {}]  }
   0x1   :  { %9 = vsyncpa [#allocation3 + $0x1], 0 }
   0x2   :  { %10 = vsyncpa [#allocation6], 0 }
   0x3   :  { %11 = vsyncpa [#allocation4], 0 }
   0x4   :  { %13 = vsyncpa [#allocation4 + $0x1], 0  ;;  %s594_s9 = smov 0   ;;  %s596_s10 = smov 0  }
   0x5   :  { %s598_s11 = smov 0   ;;  %s600_s12 = smov 0  }
   0x6   :  { %s602_s13 = smov 0   ;;  %s604_s14 = smov 0  }
   0x7 LB: > { %s340_s15 = sadd.s32 4294967295, %s574_s14   ;;  %s341_s16 = sadd.s32 4294967294, %s574_s14   ;;  %s574_s14 = sphi %s604_s14, %s19_s14   ;;  %s570_s13 = sphi %s602_s13, %s780_s13   ;;  %s566_s12 = sphi %s600_s12, %s779_s12   ;;  %s562_s11 = sphi %s598_s11, %s778_s11   ;;  %s558_s10 = sphi %s596_s10, %s777_s10   ;;  %s554_s9 = sphi %s594_s9, %s776_s9  }
   0x8   : > { %p53_p0 = scmp.ne.s32.totalorder %s558_s10, %s554_s9  ;;  %p628_p1 = scmp.eq.s32.totalorder %s340_s15, 0 }
   0x9   : > { %p632_p2 = scmp.eq.s32.totalorder %s340_s15, 1  ;;  %p111_p3 = scmp.eq.s32.totalorder %s341_s16, 1 }
   0xa   : > { %p638_p4 = por %p628_p1, %p53_p0  ;;  %p342_p5 = scmp.ge.s32.totalorder %s574_s14, 1 }
   0xb   : > { %p643_p6 = por %p111_p3, %p53_p0  ;;  %p118_p7 = scmp.lt.s32.totalorder %s574_s14, 3 }
   0xc   : > { %s767_s19 = scalar_select %p638_p4, 1, 0 }
   0xd   : > { %s768_s20 = scalar_select %p643_p6, 1, 0 }
   0xe   : > { %p648_p8 = pnand %p342_p5, %p118_p7  ;;  %s576_s22 = smov [#allocation5]  }
   0xf   : > { %s134_s23 = sshll.u32 %s576_s22, 4  ;;  %s31_s25 = sadd.s32 1, %s570_s13  ;;  %s135_s23 = int_to_ptr.vmem [resolvable:$true] %s134_s23 }
  0x10   : > { %p367_p10 = pneg %p648_p8  ;;  %s40_s26 = sadd.s32 1, %s562_s11 }
  0x11   : > { %p33_p12 = scmp.ge.s32.totalorder %s31_s25, 2  ;;  %s447_s27 = scalar_lea.vmem %s135_s23, 32 }
  0x12   : > { %p657_p11 = pnand %p367_p10, %p628_p1  ;;  %p448_p0 = scmp.ne.s32.totalorder %s135_s23, %s447_s27 }
  0x13   : > { %p455_p7 = scmp.lt.s32.totalorder %s135_s23, %s135_s23  ;;  %p456_p6 = scmp.lt.s32.totalorder %s447_s27, %s447_s27 }
  0x14   : > { %p438_p13 = pneg %p657_p11 }
  0x15   : > { %p457_p9 = por %p456_p6, %p455_p7 }
  0x16   : > { %p450_p3 = pnand %p448_p0, %p438_p13 }
  0x18   : > { %p451_p5 = pneg %p450_p3 }
  0x1a   : > { %p458_p4 = pnand %p457_p9, %p451_p5 }
  0x1c   : > { %461 = shalt.err (!%p458_p4)
}
  0x1d   : > { %370 = dma.hbm_to_vmem [thread:$0]  (!%p657_p11), %s762_s1, 32, %s135_s23, [#allocation6]  }
  0x1e   : > { %s782_s25 = smov (%p33_p12, %s31_s25), 0  ;;  %p47_p6 = scmp.ne.s32.totalorder %s562_s11, %s558_s10 }
  0x1f   : > { %p48_p4 = scmp.eq.s32.totalorder %s574_s14, 0  ;;  %s35_s30 = ssub.s32 %s570_s13, %s782_s25 }
  0x20   : > { %p380_p9 = scmp.lt.s32.totalorder %s574_s14, 2  ;;  %p38_p10 = scmp.eq.s32.totalorder %s35_s30, 0 }
  0x21   : > { %p49_p13 = por %p48_p4, %p47_p6  ;;  %p680_p0 = por %p632_p2, %p47_p6 }
  0x22   : > { %s145_s4 = sand.u32 1, %s562_s11   ;;  %s357_s7 = sshll.u32 %s570_s13, 8 }
  0x23   : > { %s686_s5 = scalar_select %p38_p10, %s562_s11, %s40_s26  }
  0x24   : > { %s345_s6 = sshll.u32 %s145_s4, 4  ;;  %s157_s16 = scalar_lea.hbm %s761_s0, %s357_s7 }
  0x25   : > { %s149_s22 = scalar_lea.vmem [#allocation2], %s345_s6  ;;  %p692_p11 = pnand %p380_p9, %p49_p13 }
  0x26   : > { %s159_s23 = sshll.u32 %s149_s22, 4  ;;  %s146_s18 = scalar_lea.sflag [#allocation3], %s145_s4  ;;  %s160_s23 = int_to_ptr.vmem [resolvable:$true] %s159_s23 }
  0x27   : > { %p464_p2 = pneg %p692_p11  ;;  %s475_s27 = scalar_lea.vmem %s160_s23, 256 }
  0x28   : > { %p476_p12 = scmp.ne.s32.totalorder %s160_s23, %s475_s27  ;;  %s577_s26 = smov [#allocation2]  }
  0x29   : > { %s480_s28 = sshll.u32 %s577_s26, 4  ;;  %s481_s28 = int_to_ptr.vmem [resolvable:$false] %s480_s28 }
  0x2a   : > { %p478_p3 = pnand %p476_p12, %p464_p2  ;;  %s482_s29 = scalar_lea.vmem %s481_s28, 512 }
  0x2b   : > { %p483_p7 = scmp.lt.s32.totalorder %s160_s23, %s481_s28  ;;  %p484_p6 = scmp.lt.s32.totalorder %s482_s29, %s475_s27 }
  0x2c   : > { %p479_p5 = pneg %p478_p3 }
  0x2d   : > { %p485_p4 = por %p484_p6, %p483_p7 }
  0x2f   : > { %p486_p10 = pnand %p485_p4, %p479_p5 }
  0x31   : > { %489 = shalt.err (!%p486_p10)
}
  0x32   : > { %374 = dma.hbm_to_vmem [thread:$0]  (!%p692_p11), %s157_s16, 256, %s160_s23, %s146_s18  }
  0x33   : > { %168 = sbr.rel (%p648_p8) target bundleno = 101 (0x65), region = 28  ;;  %s703_s30 = sand.u32 (!%p648_p8), 1, %s558_s10  }
  0x34   : > { %s349_s4 = sshll.u32 (!%p648_p8), %s703_s30, 4  ;;  %s171_s6 = scalar_lea.sflag (!%p648_p8), [#allocation3], %s703_s30 }
  0x35   : > { %s174_s7 = scalar_lea.vmem (!%p648_p8), [#allocation2], %s349_s4  ;;  %p773_p9 = scmp.ne.s32.totalorder (!%p648_p8), %s767_s19, 0 }
  0x38   : > { %541 = dma.done.wait (%p773_p9), %s171_s6, 256  }
  0x39   : > { %543 = vsyncadd (%p773_p9), %s171_s6, 4294967040 }
  0x3a   : > { %545 = dma.done.wait (%p628_p1), [#allocation6], 32  }
  0x3b   : > { %547 = vsyncadd (%p628_p1), [#allocation6], 4294967264  ;;  %v207_v0 = vlaneseq  ;;  %v202_v4 = vld [vmem:[#allocation5] sm:$0x3]  ;;  %v205_v7 = vld [vmem:[%s174_s7 + $0x8] sm:$0xff]  ;;  %s198_s17 = scalar_lea.vmem [#allocation7], %s349_s4 }
  0x3c   : > { %v203_v5 = vmul.f32 %v202_v4, %v202_v4  ;;  %v204_v6 = vld [vmem:[%s174_s7] sm:$0xff]  ;;  %s244_s19 = sshll.u32 %s198_s17, 4  ;;  %s358_s21 = sshll.u32 %s566_s12, 8  ;;  %s716_s19 = int_to_ptr.vmem [resolvable:$true] %s244_s19 }
  0x3d   : > { %v208_v1 = vshrl.u32 %v207_v0, 7  ;;  %s242_s16 = scalar_lea.hbm %s763_s2, %s358_s21  ;;  %s228_s22 = scalar_lea.sflag [#allocation4], %s703_s30 }
  0x3e   : > { %s490_s23 = scalar_lea.vmem %s716_s19, 256  ;;  %s578_s12 = smov [#allocation7]  }
  0x3f   : > { %v209_v2 = vsub.s32 0, %v208_v1  ;;  %v213_v3 = vsub.s32 1, %v208_v1  ;;  %p491_p1 = scmp.ne.s32.totalorder %s716_s19, %s490_s23  ;;  %s494_s24 = sshll.u32 %s578_s12, 4  ;;  %s495_s24 = int_to_ptr.vmem [resolvable:$false] %s494_s24 }
  0x40   : > { %s496_s18 = scalar_lea.vmem %s495_s24, 512  ;;  %p497_p11 = scmp.lt.s32.totalorder %s716_s19, %s495_s24 }
  0x41   : > { %v210_v8 = vrot.slane %v203_v5, %v209_v2  ;;  %v214_v9 = vrot.slane %v203_v5, %v213_v3  ;;  %p492_p8 = pnand %p491_p1, %p680_p0  ;;  %p498_p2 = scmp.lt.s32.totalorder %s496_s18, %s490_s23 }
  0x43   : > { %v217_v10 = vsub.f32 %v204_v6, %v210_v8  ;;  %v218_v11 = vsub.f32 %v205_v7, %v214_v9  ;;  %p493_p13 = pneg %p492_p8  ;;  %p499_p12 = por %p498_p2, %p497_p11 }
  0x45   : > { %432 = vtanh.f32 %v217_v10  ;;  %p500_p3 = pnand %p499_p12, %p493_p13 }
  0x46   : > { %434 = vtanh.f32 %v218_v11 }
  0x52   : > { %v433_v12 = vpop.eup %432 }
  0x53   : > { %v435_v13 = vpop.eup %434  ;;  %v221_v14 = vadd.f32 1.0, %v433_v12 }
  0x54   : > { %v222_v15 = vadd.f32 1.0, %v435_v13 }
  0x55   : > { %v223_v16 = vmul.f32 0.5, %v221_v14 }
  0x56   : > { %v224_v17 = vmul.f32 0.5, %v222_v15 }
  0x57   : > { %225 = vst [vmem:[%s198_s17] sm:$0xff] %v223_v16 }
  0x58   : > { %226 = vst [vmem:[%s198_s17 + $0x8] sm:$0xff] %v224_v17 }
  0x59   : > { %503 = shalt.err (!%p500_p3)
}
  0x5a   : > { %s504_s27 = scalar_lea.hbm %s242_s16, 256  ;;  %s508_s29 = scalar_lea.hbm %s763_s2, 512 }
  0x5b   : > { %p505_p5 = scmp.ne.s32.totalorder %s242_s16, %s504_s27  ;;  %p509_p4 = scmp.lt.s32.totalorder %s242_s16, %s763_s2 }
  0x5c   : > { %p510_p10 = scmp.lt.s32.totalorder %s508_s29, %s504_s27 }
  0x5d   : > { %p506_p7 = pnand %p505_p5, %p680_p0 }
  0x5e   : > { %p511_p9 = por %p510_p10, %p509_p4 }
  0x5f   : > { %p507_p6 = pneg %p506_p7 }
  0x61   : > { %p512_p1 = pnand %p511_p9, %p507_p6 }
  0x63   : > { %515 = shalt.err (!%p512_p1)
}
  0x64   : > { %365 = dma.vmem_to_hbm [thread:$0]  (%p680_p0), %s716_s19, 256, %s242_s16, %s228_s22  }
  0x65 PF: > { %s256_s6 = sand.u32 1, %s554_s9   ;;  %p774_p8 = scmp.ne.s32.totalorder %s768_s20, 0 }
  0x66   : > { %p775_p13 = scmp.ge.s32.totalorder %s574_s14, 2  ;;  %s257_s7 = scalar_lea.sflag [#allocation4], %s256_s6 }
  0x68   : > { %p376_p11 = pnand %p775_p13, %p774_p8 }
  0x6a   : > { %p377_p2 = pneg %p376_p11 }
  0x6c   : > { %549 = dma.done.wait (%p377_p2), %s257_s7, 256  }
  0x6d   : > { %551 = vsyncadd (%p377_p2), %s257_s7, 4294967040  ;;  %s19_s14 = sadd.s32 1, %s574_s14   ;;  %s776_s9 = smov %s558_s10 }
  0x6e   : > { %p16_p12 = scmp.ge.s32.totalorder %s19_s14, 4   ;;  %s777_s10 = smov %s562_s11 }
  0x6f   : > { %s778_s11 = smov %s686_s5  ;;  %s779_s12 = smov %s570_s13 }
  0x70   : > { %s780_s13 = smov %s782_s25  ;;  %18 = sbr.rel (!%p16_p12) target bundleno = 7 (0x7), region = 78 }
  0x75   :  { %262 = vsyncpa [#allocation3], 1 }
  0x76   :  { %264 = vsyncpa [#allocation3 + $0x1], 1 }
  0x77   :  { %265 = vsyncpa [#allocation6], 1 }
  0x78   :  { %266 = vsyncpa [#allocation4], 1 }
  0x79   :  { %268 = vsyncpa [#allocation4 + $0x1], 1 }

</bundles_post_ra>
